<compile_context>
chip_gen: v5e
topology: v5e:2x2
jax: 0.10.0
libtpu: 0.0.40
codegen_flags: <defaults>
</compile_context>

<pallas_src>
import math
import functools

import jax
import jax.numpy as jnp
import numpy as np
from jax.experimental import pallas as pl
from jax.experimental.pallas import tpu as pltpu


def _round_up(x, m):
    return ((x + m - 1) // m) * m


def _cdiv(a, b):
    return -(-a // b)


def _smiles_embed_kernel(ids_ref, emb_ref, pe_ref, out_ref, *, scale):
    # ids_ref: (1, k, T_r, 1) int32 -- token ids, k packed tokens per output row
    # emb_ref: (k, V_pad, k*D) f32  -- column-shifted, zero-padded table (VMEM resident)
    # pe_ref : (T_r, k*D) f32       -- lane-packed positional encodings for this tile
    # out_ref: (1, T_r, k*D) f32
    k, v_pad, _ = emb_ref.shape
    t_r = out_ref.shape[1]

    col = jax.lax.broadcasted_iota(jnp.int32, (t_r, v_pad), 1)
    acc = jnp.zeros(out_ref.shape[1:], jnp.float32)             # (T_r, k*D)
    for j in range(k):                                          # k is small & static
        ids_j = ids_ref[0, j]                                   # (T_r, 1)
        # One-hot gather on the MXU; shifted table j writes columns [j*D, (j+1)*D).
        one_hot = (ids_j == col).astype(emb_ref.dtype)          # (T_r, V_pad)
        acc = acc + jnp.dot(one_hot, emb_ref[j],
                            preferred_element_type=jnp.float32)  # (T_r, k*D)

    # TODO(synk): dropout is identity here (eval-mode semantics); training-mode dropout
    # would use pltpu.prng_seed/prng_random_bits but cannot bit-match torch RNG.
    out_ref[0] = (acc * scale + pe_ref[...]).astype(out_ref.dtype)


def prepare_embedding_table(emb_table):
    """One-time setup: zero-pad vocab to a multiple of 128 and build k column-shifted
    copies so the gather accumulates directly into a lane-dense (.., k*D) tile.

    Returns emb_shift of shape (k, V_pad, k*D)."""
    V, D = emb_table.shape
    k = 128 // D if (D < 128 and 128 % D == 0) else 1
    v_pad = _round_up(V, 128)
    emb_p = jnp.pad(emb_table, ((0, v_pad - V), (0, 0)))
    shifted = [jnp.pad(emb_p, ((0, 0), (j * D, (k - 1 - j) * D))) for j in range(k)]
    return jnp.stack(shifted, axis=0)


def smiles_embedding(tokens, emb_shift, pe_table, *, d_model, token_tile=2048):
    """tokens: (B, S) int ids in [0, V); emb_shift: prepare_embedding_table() output;
    pe_table: (max_len, D) f32. Out-of-range ids silently gather a zero row (they do
    not error like nn.Embedding) -- callers should validate ids."""
    B, S = tokens.shape
    k, v_pad, kd = emb_shift.shape
    D = kd // k
    assert D == d_model and k * D == kd

    # --- generation-aware VMEM budget ------------------------------------------------
    try:
        vmem_cap = int(pltpu.get_tpu_info().vmem_capacity_bytes)
    except Exception:
        vmem_cap = 64 * 1024 * 1024          # conservative (v7x per-TC capacity)
    budget = int(vmem_cap * 0.7)             # headroom; table duplicated per TC on v7x

    def ws_bytes(t_rows):
        itemsize = 4
        table = k * v_pad * kd * itemsize            # resident table (single-buffered)
        onehot = t_rows * v_pad * itemsize           # per-j one-hot temp
        acc = t_rows * kd * itemsize                 # f32 accumulator
        pe = 2 * t_rows * kd * itemsize              # double-buffered PE block
        outb = 2 * t_rows * kd * itemsize            # double-buffered out block
        ids = 2 * k * t_rows * itemsize              # double-buffered id block
        return table + onehot + acc + pe + outb + ids

    # --- token tile: large by default, clamped by S and by the VMEM budget -----------
    quantum = 8 * k                                  # keeps T_r a multiple of 8
    t_tok = min(_round_up(token_tile, quantum), _round_up(S, quantum))
    while t_tok > quantum and ws_bytes(t_tok // k) > budget:
        t_tok = max(quantum, _round_up(t_tok // 2, quantum))
    t_r = t_tok // k

    n_s = _cdiv(S, t_tok)
    s_pad = n_s * t_tok

    # --- inputs: lane-packed views (cheap metadata ops, no N*D materialization) ------
    ids = tokens.astype(jnp.int32)
    ids = jnp.pad(ids, ((0, 0), (0, s_pad - S)))
    ids = ids.reshape(B, s_pad // k, k).transpose(0, 2, 1)[..., None]   # (B,k,S_pad/k,1)

    max_len = pe_table.shape[0]
    if s_pad <= max_len:
        pe_use = pe_table[:s_pad]
    else:  # only padded tail rows exceed max_len; they are sliced off below
        pe_use = jnp.pad(pe_table, ((0, s_pad - max_len), (0, 0)))
    pe_use = pe_use.reshape(s_pad // k, kd)                             # (S_pad/k, k*D)

    usage = ws_bytes(t_r)
    vmem_limit = int(min(vmem_cap * 0.9, max(4 * usage, 32 * 1024 * 1024)))

    scale = math.sqrt(d_model)
    kernel = functools.partial(_smiles_embed_kernel, scale=scale)

    out_packed = pl.pallas_call(
        kernel,
        out_shape=jax.ShapeDtypeStruct((B, s_pad // k, kd), emb_shift.dtype),
        grid_spec=pltpu.PrefetchScalarGridSpec(
            num_scalar_prefetch=0,
            grid=(B, n_s),
            in_specs=[
                pl.BlockSpec((1, k, t_r, 1), lambda b, s: (b, 0, s, 0)),   # token ids
                pl.BlockSpec((k, v_pad, kd), lambda b, s: (0, 0, 0)),      # table (resident)
                pl.BlockSpec((t_r, kd), lambda b, s: (s, 0)),              # PE tile (no tiling pre-pass)
            ],
            out_specs=pl.BlockSpec((1, t_r, kd), lambda b, s: (b, s, 0)),
        ),
        compiler_params=pltpu.CompilerParams(
            dimension_semantics=("parallel", "parallel"),
            vmem_limit_bytes=vmem_limit,
        ),
    )(ids, emb_shift, pe_use)

    # Undo the lane packing (row-major reshape is free) and drop the padded tail.
    return out_packed.reshape(B, s_pad, D)[:, :S, :]


def make_positional_encoding(max_len, d_model):
    # Mirrors the PyTorch PositionalEncoding buffer construction (even d_model).
    position = np.arange(0, max_len, dtype=np.float32)[:, None]            # (max_len, 1)
    div_term = np.exp(np.arange(0, d_model, 2, dtype=np.float32)
                      * -(math.log(10000.0) / d_model))                    # (d_model/2,)
    pe = np.zeros((max_len, d_model), dtype=np.float32)
    pe[:, 0::2] = np.sin(position * div_term)
    pe[:, 1::2] = np.cos(position * div_term)
    return jnp.asarray(pe)


if __name__ == "__main__":
    # Small, deterministic setup.
    size_vocab = 64
    d_model = 32
    batch, seq_len = 2, 8
    max_len = 128

    key = jax.random.PRNGKey(0)
    k_emb, k_tok = jax.random.split(key)

    # nn.Embedding default init: N(0, 1)
    emb_table = jax.random.normal(k_emb, (size_vocab, d_model), dtype=jnp.float32)
    pe_table = make_positional_encoding(max_len, d_model)
    tokens = jax.random.randint(k_tok, (batch, seq_len), 0, size_vocab, dtype=jnp.int32)

    # Table prep is setup-time work (hoisted out of the forward hot path).
    emb_shift = prepare_embedding_table(emb_table)

    out = smiles_embedding(tokens, emb_shift, pe_table, d_model=d_model)
    out = jax.block_until_ready(out)

    # Pure-JAX reference for correctness.
    ref = emb_table[tokens] * math.sqrt(d_model) + pe_table[None, :seq_len, :]
    assert out.shape == (batch, seq_len, d_model)
    np.testing.assert_allclose(np.asarray(out), np.asarray(ref), rtol=1e-5, atol=1e-5)

    print("KERNEL_OK")
</pallas_src>

<mosaic_0001>
module attributes {stable_mosaic.version = 11 : i64} {
  func.func @_smiles_embed_kernel(%arg0: i32, %arg1: i32, %arg2: memref<1x4x8x1xi32, #tpu.memory_space<vmem>>, %arg3: memref<4x128x128xf32, #tpu.memory_space<vmem>>, %arg4: memref<8x128xf32, #tpu.memory_space<vmem>>, %arg5: memref<1x8x128xf32, #tpu.memory_space<vmem>>) attributes {dimension_semantics = [#tpu.dimension_semantics<parallel>, #tpu.dimension_semantics<parallel>], iteration_bounds = array<i64: 2, 1>, scalar_prefetch = 0 : i64, scratch_operands = 0 : i64, tpu.core_type = #tpu.core_type<tc>, window_params = [{transform_indices = @transform_0, window_bounds = array<i64: 1, 4, 8, 1>}, {pipeline_mode = #tpu.pipeline_mode<synchronous>, transform_indices = @transform_1, window_bounds = array<i64: 4, 128, 128>}, {transform_indices = @transform_2, window_bounds = array<i64: 8, 128>}, {transform_indices = @transform_3, window_bounds = array<i64: 1, 8, 128>}]} {
    %0 = tpu.iota {dimensions = array<i32: 1>} : vector<8x128xi32>
    %cst = arith.constant 0.000000e+00 : f32
    %1 = vector.broadcast %cst : f32 to vector<8x128xf32>
    %c0 = arith.constant 0 : index
    %c0_0 = arith.constant 0 : index
    %c0_1 = arith.constant 0 : index
    %c0_2 = arith.constant 0 : index
    %2 = vector.load %arg2[%c0, %c0_0, %c0_1, %c0_2] : memref<1x4x8x1xi32, #tpu.memory_space<vmem>>, vector<1x1x8x1xi32>
    %3 = vector.shape_cast %2 : vector<1x1x8x1xi32> to vector<8x1xi32>
    %4 = vector.broadcast %3 : vector<8x1xi32> to vector<8x128xi32>
    %5 = arith.cmpi eq, %4, %0 : vector<8x128xi32>
    %6 = arith.extui %5 : vector<8x128xi1> to vector<8x128xi32>
    %7 = arith.sitofp %6 : vector<8x128xi32> to vector<8x128xf32>
    %c0_3 = arith.constant 0 : index
    %c0_4 = arith.constant 0 : index
    %c0_5 = arith.constant 0 : index
    %8 = vector.load %arg3[%c0_3, %c0_4, %c0_5] : memref<4x128x128xf32, #tpu.memory_space<vmem>>, vector<1x128x128xf32>
    %9 = vector.shape_cast %8 : vector<1x128x128xf32> to vector<128x128xf32>
    %cst_6 = arith.constant dense<0.000000e+00> : vector<8x128xf32>
    %10 = tpu.matmul %7, %9, %cst_6 {dimension_numbers = #tpu.dot_dimension_numbers<[1], [0], [0], [1], [0, 0, 1, 1], [], []>} : vector<8x128xf32>, vector<128x128xf32>, vector<8x128xf32> -> vector<8x128xf32>
    %11 = arith.addf %1, %10 : vector<8x128xf32>
    %c0_7 = arith.constant 0 : index
    %c1 = arith.constant 1 : index
    %c0_8 = arith.constant 0 : index
    %c0_9 = arith.constant 0 : index
    %12 = vector.load %arg2[%c0_7, %c1, %c0_8, %c0_9] : memref<1x4x8x1xi32, #tpu.memory_space<vmem>>, vector<1x1x8x1xi32>
    %13 = vector.shape_cast %12 : vector<1x1x8x1xi32> to vector<8x1xi32>
    %14 = vector.broadcast %13 : vector<8x1xi32> to vector<8x128xi32>
    %15 = arith.cmpi eq, %14, %0 : vector<8x128xi32>
    %16 = arith.extui %15 : vector<8x128xi1> to vector<8x128xi32>
    %17 = arith.sitofp %16 : vector<8x128xi32> to vector<8x128xf32>
    %c1_10 = arith.constant 1 : index
    %c0_11 = arith.constant 0 : index
    %c0_12 = arith.constant 0 : index
    %18 = vector.load %arg3[%c1_10, %c0_11, %c0_12] : memref<4x128x128xf32, #tpu.memory_space<vmem>>, vector<1x128x128xf32>
    %19 = vector.shape_cast %18 : vector<1x128x128xf32> to vector<128x128xf32>
    %cst_13 = arith.constant dense<0.000000e+00> : vector<8x128xf32>
    %20 = tpu.matmul %17, %19, %cst_13 {dimension_numbers = #tpu.dot_dimension_numbers<[1], [0], [0], [1], [0, 0, 1, 1], [], []>} : vector<8x128xf32>, vector<128x128xf32>, vector<8x128xf32> -> vector<8x128xf32>
    %21 = arith.addf %11, %20 : vector<8x128xf32>
    %c0_14 = arith.constant 0 : index
    %c2 = arith.constant 2 : index
    %c0_15 = arith.constant 0 : index
    %c0_16 = arith.constant 0 : index
    %22 = vector.load %arg2[%c0_14, %c2, %c0_15, %c0_16] : memref<1x4x8x1xi32, #tpu.memory_space<vmem>>, vector<1x1x8x1xi32>
    %23 = vector.shape_cast %22 : vector<1x1x8x1xi32> to vector<8x1xi32>
    %24 = vector.broadcast %23 : vector<8x1xi32> to vector<8x128xi32>
    %25 = arith.cmpi eq, %24, %0 : vector<8x128xi32>
    %26 = arith.extui %25 : vector<8x128xi1> to vector<8x128xi32>
    %27 = arith.sitofp %26 : vector<8x128xi32> to vector<8x128xf32>
    %c2_17 = arith.constant 2 : index
    %c0_18 = arith.constant 0 : index
    %c0_19 = arith.constant 0 : index
    %28 = vector.load %arg3[%c2_17, %c0_18, %c0_19] : memref<4x128x128xf32, #tpu.memory_space<vmem>>, vector<1x128x128xf32>
    %29 = vector.shape_cast %28 : vector<1x128x128xf32> to vector<128x128xf32>
    %cst_20 = arith.constant dense<0.000000e+00> : vector<8x128xf32>
    %30 = tpu.matmul %27, %29, %cst_20 {dimension_numbers = #tpu.dot_dimension_numbers<[1], [0], [0], [1], [0, 0, 1, 1], [], []>} : vector<8x128xf32>, vector<128x128xf32>, vector<8x128xf32> -> vector<8x128xf32>
    %31 = arith.addf %21, %30 : vector<8x128xf32>
    %c0_21 = arith.constant 0 : index
    %c3 = arith.constant 3 : index
    %c0_22 = arith.constant 0 : index
    %c0_23 = arith.constant 0 : index
    %32 = vector.load %arg2[%c0_21, %c3, %c0_22, %c0_23] : memref<1x4x8x1xi32, #tpu.memory_space<vmem>>, vector<1x1x8x1xi32>
    %33 = vector.shape_cast %32 : vector<1x1x8x1xi32> to vector<8x1xi32>
    %34 = vector.broadcast %33 : vector<8x1xi32> to vector<8x128xi32>
    %35 = arith.cmpi eq, %34, %0 : vector<8x128xi32>
    %36 = arith.extui %35 : vector<8x128xi1> to vector<8x128xi32>
    %37 = arith.sitofp %36 : vector<8x128xi32> to vector<8x128xf32>
    %c3_24 = arith.constant 3 : index
    %c0_25 = arith.constant 0 : index
    %c0_26 = arith.constant 0 : index
    %38 = vector.load %arg3[%c3_24, %c0_25, %c0_26] : memref<4x128x128xf32, #tpu.memory_space<vmem>>, vector<1x128x128xf32>
    %39 = vector.shape_cast %38 : vector<1x128x128xf32> to vector<128x128xf32>
    %cst_27 = arith.constant dense<0.000000e+00> : vector<8x128xf32>
    %40 = tpu.matmul %37, %39, %cst_27 {dimension_numbers = #tpu.dot_dimension_numbers<[1], [0], [0], [1], [0, 0, 1, 1], [], []>} : vector<8x128xf32>, vector<128x128xf32>, vector<8x128xf32> -> vector<8x128xf32>
    %41 = arith.addf %31, %40 : vector<8x128xf32>
    %cst_28 = arith.constant 5.65685415 : f32
    %42 = vector.broadcast %cst_28 : f32 to vector<8x128xf32>
    %43 = arith.mulf %41, %42 : vector<8x128xf32>
    %c0_29 = arith.constant 0 : index
    %c0_30 = arith.constant 0 : index
    %44 = vector.load %arg4[%c0_29, %c0_30] : memref<8x128xf32, #tpu.memory_space<vmem>>, vector<8x128xf32>
    %45 = arith.addf %43, %44 : vector<8x128xf32>
    %c0_31 = arith.constant 0 : index
    %c0_32 = arith.constant 0 : index
    %c0_33 = arith.constant 0 : index
    %46 = vector.load %arg5[%c0_31, %c0_32, %c0_33] : memref<1x8x128xf32, #tpu.memory_space<vmem>>, vector<1x8x128xf32>
    %47 = vector.shape_cast %46 : vector<1x8x128xf32> to vector<8x128xf32>
    %48 = vector.shape_cast %45 : vector<8x128xf32> to vector<1x8x128xf32>
    tpu.vector_store %arg5[%c0_31, %c0_32, %c0_33], %48 {strides = array<i32>} : memref<1x8x128xf32, #tpu.memory_space<vmem>>, vector<1x8x128xf32>,
    return
  }
  func.func @transform_0(%arg0: i32, %arg1: i32) -> (i32, i32, i32, i32) {
    %c0_i32 = arith.constant 0 : i32
    %c0_i32_0 = arith.constant 0 : i32
    %c0_i32_1 = arith.constant 0 : i32
    return %arg0, %c0_i32, %arg1, %c0_i32_0 : i32, i32, i32, i32
  }
  func.func @transform_1(%arg0: i32, %arg1: i32) -> (i32, i32, i32) {
    %c0_i32 = arith.constant 0 : i32
    %c0_i32_0 = arith.constant 0 : i32
    %c0_i32_1 = arith.constant 0 : i32
    %c0_i32_2 = arith.constant 0 : i32
    return %c0_i32, %c0_i32_0, %c0_i32_1 : i32, i32, i32
  }
  func.func @transform_2(%arg0: i32, %arg1: i32) -> (i32, i32) {
    %c0_i32 = arith.constant 0 : i32
    %c0_i32_0 = arith.constant 0 : i32
    return %arg1, %c0_i32 : i32, i32
  }
  func.func @transform_3(%arg0: i32, %arg1: i32) -> (i32, i32, i32) {
    %c0_i32 = arith.constant 0 : i32
    %c0_i32_0 = arith.constant 0 : i32
    return %arg0, %arg1, %c0_i32 : i32, i32, i32
  }
}

</mosaic_0001>

<bundles_post_ra>
// kernel: tpu_custom_call.1
= control target key start
LH: loop header
LB: loop body
LE: loop exit
PB: predicated region body
PF: predicated region fallthrough
CT: control target
= control target key end

     0   :  { %8 = vsyncpa [#allocation3], 0  ;;  %s873_s0 = inlined_call_operand.vmem [shape: s32[2,4,8,1], index: 0, kind: input, shape index: {}]   ;;  %s874_s1 = inlined_call_operand.hbm [shape: f32[4,128,128], index: 1, kind: input, shape index: {}]   ;;  %s875_s2 = inlined_call_operand.vmem [shape: f32[8,128], index: 2, kind: input, shape index: {}]   ;;  %s876_s3 = inlined_call_operand.hbm [shape: f32[2,8,128], index: 3, kind: output, shape index: {}]  }
   0x1   :  { %9 = vsyncpa [#allocation4], 0 }
   0x2   :  { %11 = vsyncpa [#allocation4 + $0x1], 0  ;;  %s770_s12 = smov 0   ;;  %s772_s13 = smov 0  }
   0x3   :  { %s774_s14 = smov 0   ;;  %s776_s15 = smov 0  }
   0x4   :  { %s778_s16 = smov 0   ;;  %s780_s17 = smov 0  }
   0x5 LB: > { %s532_s18 = sadd.s32 4294967295, %s743_s17   ;;  %s533_s19 = sadd.s32 4294967294, %s743_s17   ;;  %s743_s17 = sphi %s780_s17, %s17_s17   ;;  %s739_s16 = sphi %s778_s16, %s883_s16   ;;  %s735_s15 = sphi %s776_s15, %s882_s15   ;;  %s731_s14 = sphi %s774_s14, %s881_s14   ;;  %s727_s13 = sphi %s772_s13, %s880_s13   ;;  %s723_s12 = sphi %s770_s12, %s879_s12  }
   0x6   : > { %s29_s20 = sadd.s32 1, %s739_s16  ;;  %s113_s21 = sadd.s32 1, %s731_s14 }
   0x7   : > { %p31_p0 = scmp.ge.s32.totalorder %s29_s20, 2  ;;  %p123_p1 = scmp.ne.s32.totalorder %s731_s14, %s727_s13 }
   0x8   : > { %p124_p2 = scmp.eq.s32.totalorder %s532_s18, 1  ;;  %p129_p3 = scmp.ne.s32.totalorder %s727_s13, %s723_s12 }
   0x9   : > { %s885_s20 = smov (%p31_p0, %s29_s20), 0  ;;  %p130_p5 = scmp.eq.s32.totalorder %s533_s19, 1 }
   0xa   : > { %p810_p4 = por %p124_p2, %p123_p1  ;;  %s108_s23 = ssub.s32 %s739_s16, %s885_s20 }
   0xb   : > { %p534_p6 = scmp.ge.s32.totalorder %s743_s17, 1  ;;  %p111_p7 = scmp.eq.s32.totalorder %s108_s23, 0 }
   0xc   : > { %p817_p8 = por %p130_p5, %p129_p3  ;;  %p137_p9 = scmp.lt.s32.totalorder %s743_s17, 3 }
   0xd   : > { %s823_s25 = scalar_select %p111_p7, %s731_s14, %s113_s21  }
   0xe   : > { %p138_p10 = pnand %p534_p6, %p137_p9  ;;  %p573_p11 = scmp.eq.s32.totalorder %s532_s18, 0 }
   0xf   : > { %s148_s28 = sshll.u32 %s874_s1, 4  ;;  %s745_s29 = smov [#allocation2]   ;;  %s149_s28 = int_to_ptr.hbm [resolvable:$true] %s148_s28 }
  0x10   : > { %p565_p12 = pneg %p138_p10  ;;  %s150_s30 = sshll.u32 %s745_s29, 4  ;;  %s151_s30 = int_to_ptr.vmem [resolvable:$true] %s150_s30 }
  0x11   : > { %s746_s4 = smov 128   ;;  %s747_s5 = smov 8  }
  0x12   : > { %p566_p13 = pnand %p573_p11, %p565_p12  ;;  %184 = sbr.rel (%p138_p10) target bundleno = 296 (0x128), region = 32 }
  0x14   : > { %568 = dma.hbm_to_vmem [thread:$0]  (!%p566_p13), %s149_s28, 8192, %s151_s30, [#allocation3], %s746_s4, %s746_s4, %s747_s5  }
  0x17   : > { %714 = dma.done.wait (%p573_p11), [#allocation3], 8192  }
  0x18   : > { %716 = vsyncadd (%p573_p11), [#allocation3], 4294959104  ;;  %p216_p0 = scmp.lt.s32.totalorder %s735_s15, 1  ;;  %v748_v0 = vmov 0   ;;  %v342_v3 = vld [vmem:[#allocation2 + $0x178] sm:$0xff]  ;;  %v341_v5 = vld [vmem:[#allocation2 + $0x170] sm:$0xff] }
  0x19   : > { %630 = vset.pattern.permute.xlu1 %v748_v0  ;;  %629 = vset.pattern.permute.xlu0 %v748_v0  ;;  %v252_v4 = vld [vmem:[#allocation2 + $0x78] sm:$0xff]  ;;  %v251_v6 = vld [vmem:[#allocation2 + $0x70] sm:$0xff]  ;;  %v340_v7 = vld [vmem:[#allocation2 + $0x168] sm:$0xff]  ;;  %s213_s11 = sand.u32 1, %s727_s13   ;;  %s555_s19 = sshll.u32 %s735_s15, 3 }
  0x1a   : > { %s217_s6 = scalar_select %p216_p0, %s735_s15, 1  ;;  %343 = vmatpush.msra.mxu2 %v342_v3  ;;  %298 = vmatpush.msra.mxu1 %v252_v4  ;;  %v250_v8 = vld [vmem:[#allocation2 + $0x68] sm:$0xff]  ;;  %v277_v9 = vld [vmem:[#allocation2 + $0xf8] sm:$0xff]  ;;  %v339_v11 = vld [vmem:[#allocation2 + $0x160] sm:$0xff] }
  0x1b   : > { %v388_v10 = vld [vmem:[#allocation2 + $0x1f8] sm:$0xff]  ;;  %278 = vmatpush.msra.mxu0 %v277_v9  ;;  %v249_v12 = vld [vmem:[#allocation2 + $0x60] sm:$0xff]  ;;  %v276_v13 = vld [vmem:[#allocation2 + $0xf0] sm:$0xff]  ;;  %v749_v9 = vmov 1.0   ;;  %s540_s18 = sshll.u32 %s213_s11, 3  ;;  %s426_s26 = scalar_lea.hbm %s876_s3, %s555_s19 }
  0x1c   : > { %s558_s7 = sshll.u32 %s217_s6, 5  ;;  %344 = vmatpush.msra.mxu2 %v341_v5  ;;  %299 = vmatpush.msra.mxu1 %v251_v6  ;;  %v387_v16 = vld [vmem:[#allocation2 + $0x1f0] sm:$0xff]  ;;  %v338_v17 = vld [vmem:[#allocation2 + $0x158] sm:$0xff]  ;;  %v275_v19 = vld [vmem:[#allocation2 + $0xe8] sm:$0xff]  ;;  %v228_v5 = vlaneseq  ;;  %s215_s29 = scalar_lea.vmem [#allocation5], %s540_s18 }
  0x1d   : > { %s223_s10 = scalar_lea.vmem %s873_s0, %s558_s7  ;;  %389 = vmatpush.msra.mxu3 %v388_v10  ;;  %279 = vmatpush.msra.mxu0 %v276_v13  ;;  %v248_v18 = vld [vmem:[#allocation2 + $0x58] sm:$0xff]  ;;  %v386_v20 = vld [vmem:[#allocation2 + $0x1e8] sm:$0xff]  ;;  %v337_v21 = vld [vmem:[#allocation2 + $0x150] sm:$0xff]  ;;  %s428_s30 = sshll.u32 %s215_s29, 4  ;;  %s429_s30 = int_to_ptr.vmem [resolvable:$true] %s428_s30 }
  0x1e   : > { %v548_v1 = vld [vmem:[%s223_s10 + $0x10] sm:$0xff]  ;;  %v230_v2 = vld [vmem:[%s223_s10] sm:$0xff]  ;;  %v551_v14 = vld [vmem:[%s223_s10 + $0x18] sm:$0xff]  ;;  %345 = vmatpush.msra.mxu2 %v340_v7  ;;  %300 = vmatpush.msra.mxu1 %v250_v8  ;;  %v229_v6 = vand.u32 127, %v228_v5  ;;  %s430_s4 = sshll.u32 %s426_s26, 4  ;;  %s415_s15 = scalar_lea.sflag [#allocation4], %s213_s11  ;;  %s431_s4 = int_to_ptr.hbm [resolvable:$true] %s430_s4 }
  0x1f   : > { %321 = vperm.xlu0 %629, %v548_v1   ;;  %232 = vperm.xlu1 %630, %v230_v2   ;;  %v544_v15 = vld [vmem:[%s223_s10 + $0x8] sm:$0xff]  ;;  %v247_v22 = vld [vmem:[#allocation2 + $0x50] sm:$0xff]  ;;  %v274_v23 = vld [vmem:[#allocation2 + $0xe0] sm:$0xff]  ;;  %s675_s5 = sshra.s32 %s431_s4, 4  ;;  %s681_s9 = scalar_lea.hbm %s876_s3, 16  ;;  %s676_s5 = int_to_ptr.hbm [resolvable:$true] %s675_s5 }
  0x20   : > { %390 = vmatpush.msra.mxu3 %v387_v16  ;;  %346 = vmatpush.msra.mxu2 %v339_v11  ;;  %v385_v24 = vld [vmem:[#allocation2 + $0x1e0] sm:$0xff]  ;;  %v336_v25 = vld [vmem:[#allocation2 + $0x148] sm:$0xff]  ;;  %v273_v27 = vld [vmem:[#allocation2 + $0xd8] sm:$0xff]  ;;  %s677_s6 = scalar_lea.hbm %s676_s5, 8  ;;  %p682_p5 = scmp.lt.s32.totalorder %s676_s5, %s876_s3 }
  0x21   : > { %301 = vmatpush.msra.mxu1 %v249_v12  ;;  %280 = vmatpush.msra.mxu0 %v275_v19  ;;  %v246_v26 = vld [vmem:[#allocation2 + $0x48] sm:$0xff]  ;;  %v384_v28 = vld [vmem:[#allocation2 + $0x1d8] sm:$0xff]  ;;  %v335_v29 = vld [vmem:[#allocation2 + $0x140] sm:$0xff]  ;;  %p678_p1 = scmp.ne.s32.totalorder %s676_s5, %s677_s6  ;;  %p683_p6 = scmp.lt.s32.totalorder %s681_s9, %s677_s6 }
  0x22   : > { %347 = vmatpush.msra.mxu2 %v338_v17  ;;  %391 = vmatpush.msra.mxu3 %v386_v20  ;;  %v245_v30 = vld [vmem:[#allocation2 + $0x40] sm:$0xff]  ;;  %v272_v31 = vld [vmem:[#allocation2 + $0xd0] sm:$0xff]  ;;  %v334_v33 = vld [vmem:[#allocation2 + $0x138] sm:$0xff] }
  0x23   : > { %302 = vmatpush.msra.mxu1 %v248_v18  ;;  %281 = vmatpush.msra.mxu0 %v274_v23  ;;  %v383_v32 = vld [vmem:[#allocation2 + $0x1d0] sm:$0xff]  ;;  %v244_v34 = vld [vmem:[#allocation2 + $0x38] sm:$0xff]  ;;  %v271_v35 = vld [vmem:[#allocation2 + $0xc8] sm:$0xff]  ;;  %p679_p2 = pnand %p678_p1, %p810_p4  ;;  %p684_p7 = por %p683_p6, %p682_p5 }
  0x24   : > { %348 = vmatpush.msra.mxu2 %v337_v21  ;;  %392 = vmatpush.msra.mxu3 %v385_v24  ;;  %v382_v36 = vld [vmem:[#allocation2 + $0x1c8] sm:$0xff]  ;;  %v333_v37 = vld [vmem:[#allocation2 + $0x130] sm:$0xff]  ;;  %v270_v39 = vld [vmem:[#allocation2 + $0xc0] sm:$0xff] }
  0x25   : > { %303 = vmatpush.msra.mxu1 %v247_v22  ;;  %282 = vmatpush.msra.mxu0 %v273_v27  ;;  %v243_v38 = vld [vmem:[#allocation2 + $0x30] sm:$0xff]  ;;  %v381_v40 = vld [vmem:[#allocation2 + $0x1c0] sm:$0xff]  ;;  %v332_v41 = vld [vmem:[#allocation2 + $0x128] sm:$0xff]  ;;  %p680_p3 = pneg %p679_p2 }
  0x26   : > { %349 = vmatpush.msra.mxu2 %v336_v25  ;;  %393 = vmatpush.msra.mxu3 %v384_v28  ;;  %v242_v42 = vld [vmem:[#allocation2 + $0x28] sm:$0xff]  ;;  %v269_v43 = vld [vmem:[#allocation2 + $0xb8] sm:$0xff]  ;;  %v331_v45 = vld [vmem:[#allocation2 + $0x120] sm:$0xff] }
  0x27   : > { %367 = vperm.xlu0 %629, %v551_v14   ;;  %256 = vperm.xlu1 %630, %v544_v15   ;;  %v380_v44 = vld [vmem:[#allocation2 + $0x1b8] sm:$0xff]  ;;  %v241_v46 = vld [vmem:[#allocation2 + $0x20] sm:$0xff]  ;;  %v268_v47 = vld [vmem:[#allocation2 + $0xb0] sm:$0xff]  ;;  %p685_p9 = pnand %p684_p7, %p680_p3 }
  0x28   : > { %304 = vmatpush.msra.mxu1 %v246_v26  ;;  %350 = vmatpush.msra.mxu2 %v335_v29  ;;  %v379_v48 = vld [vmem:[#allocation2 + $0x1b0] sm:$0xff]  ;;  %v330_v49 = vld [vmem:[#allocation2 + $0x118] sm:$0xff]  ;;  %v267_v51 = vld [vmem:[#allocation2 + $0xa8] sm:$0xff] }
  0x29   : > { %283 = vmatpush.msra.mxu0 %v272_v31  ;;  %394 = vmatpush.msra.mxu3 %v383_v32  ;;  %v240_v50 = vld [vmem:[#allocation2 + $0x18] sm:$0xff]  ;;  %v378_v52 = vld [vmem:[#allocation2 + $0x1a8] sm:$0xff]  ;;  %v329_v53 = vld [vmem:[#allocation2 + $0x110] sm:$0xff] }
  0x2a   : > { %305 = vmatpush.msra.mxu1 %v245_v30  ;;  %351 = vmatpush.msra.mxu2 %v334_v33  ;;  %v239_v54 = vld [vmem:[#allocation2 + $0x10] sm:$0xff]  ;;  %v328_v55 = vld [vmem:[#allocation2 + $0x108] sm:$0xff]  ;;  %v266_v56 = vld [vmem:[#allocation2 + $0xa0] sm:$0xff] }
  0x2b   : > { %284 = vmatpush.msra.mxu0 %v271_v35  ;;  %395 = vmatpush.msra.mxu3 %v382_v36  ;;  %v238_v57 = vld [vmem:[#allocation2 + $0x8] sm:$0xff]  ;;  %v327_v58 = vld [vmem:[#allocation2 + $0x100] sm:$0xff]  ;;  %v265_v60 = vld [vmem:[#allocation2 + $0x98] sm:$0xff] }
  0x2c   : > { %306 = vmatpush.msra.mxu1 %v244_v34  ;;  %352 = vmatpush.msra.mxu2 %v333_v37  ;;  %v377_v59 = vld [vmem:[#allocation2 + $0x1a0] sm:$0xff]  ;;  %v376_v62 = vld [vmem:[#allocation2 + $0x198] sm:$0xff]  ;;  %v264_v63 = vld [vmem:[#allocation2 + $0x90] sm:$0xff] }
  0x2d   : > { %285 = vmatpush.msra.mxu0 %v270_v39  ;;  %396 = vmatpush.msra.mxu3 %v381_v40  ;;  %v237_v61 = vld [vmem:[#allocation2] sm:$0xff]  ;;  %v375_v0 = vld [vmem:[#allocation2 + $0x190] sm:$0xff]  ;;  %v263_v1 = vld [vmem:[#allocation2 + $0x88] sm:$0xff] }
  0x2e   : > { %307 = vmatpush.msra.mxu1 %v243_v38  ;;  %353 = vmatpush.msra.mxu2 %v332_v41  ;;  %v374_v2 = vld [vmem:[#allocation2 + $0x188] sm:$0xff]  ;;  %v262_v3 = vld [vmem:[#allocation2 + $0x80] sm:$0xff] }
  0x2f   : > { %286 = vmatpush.msra.mxu0 %v269_v43  ;;  %397 = vmatpush.msra.mxu3 %v380_v44  ;;  %v373_v4 = vld [vmem:[#allocation2 + $0x180] sm:$0xff] }
  0x30   : > { %308 = vmatpush.msra.mxu1 %v242_v42  ;;  %354 = vmatpush.msra.mxu2 %v331_v45  ;;  %v411_v19 = vld [vmem:[%s875_s2] sm:$0xff] }
  0x31   : > { %287 = vmatpush.msra.mxu0 %v268_v47  ;;  %398 = vmatpush.msra.mxu3 %v379_v48 }
  0x32   : > { %309 = vmatpush.msra.mxu1 %v241_v46  ;;  %355 = vmatpush.msra.mxu2 %v330_v49 }
  0x33   : > { %288 = vmatpush.msra.mxu0 %v267_v51  ;;  %399 = vmatpush.msra.mxu3 %v378_v52 }
  0x34   : > { %310 = vmatpush.msra.mxu1 %v240_v50  ;;  %356 = vmatpush.msra.mxu2 %v329_v53 }
  0x35   : > { %289 = vmatpush.msra.mxu0 %v266_v56  ;;  %400 = vmatpush.msra.mxu3 %v377_v59 }
  0x36   : > { %311 = vmatpush.msra.mxu1 %v239_v54  ;;  %357 = vmatpush.msra.mxu2 %v328_v55 }
  0x37   : > { %290 = vmatpush.msra.mxu0 %v265_v60  ;;  %401 = vmatpush.msra.mxu3 %v376_v62 }
  0x38   : > { %312 = vmatpush.msra.mxu1 %v238_v57  ;;  %358 = vmatpush.msra.mxu2 %v327_v58 }
  0x39   : > { %291 = vmatpush.msra.mxu0 %v264_v63  ;;  %402 = vmatpush.msra.mxu3 %v375_v0 }
  0x3a   : > { %313 = vmatpush.msra.mxu1 %v237_v61 }
  0x3b   : > { %292 = vmatpush.msra.mxu0 %v263_v1  ;;  %403 = vmatpush.msra.mxu3 %v374_v2 }
  0x3d   : > { %293 = vmatpush.msra.mxu0 %v262_v3  ;;  %404 = vmatpush.msra.mxu3 %v373_v4 }
  0x91   : > { %v322_v7 = vpop.permute.xlu0 %321  ;;  %v233_v8 = vpop.permute.xlu1 %232 }
  0x92   : > { %vm323_vm0 = vcmp.eq.s32.totalorder %v322_v7, %v229_v6  ;;  %vm234_vm1 = vcmp.eq.s32.totalorder %v233_v8, %v229_v6 }
  0x93   : > { %550 = vmatmul.msk.f32.vlgmr.msra.gmra.mxu2 %vm323_vm0, %v749_v9  ;;  %547 = vmatmul.msk.f32.vlgmr.msra.gmra.mxu1 %vm234_vm1, %v749_v9 }
  0x99   : > { %v368_v10 = vpop.permute.xlu0 %367  ;;  %v257_v11 = vpop.permute.xlu1 %256 }
  0x9a   : > { %vm369_vm2 = vcmp.eq.s32.totalorder %v368_v10, %v229_v6  ;;  %vm258_vm3 = vcmp.eq.s32.totalorder %v257_v11, %v229_v6 }
  0x9b   : > { %546 = vmatmul.msk.f32.vlgmr.msra.gmra.mxu0 %vm258_vm3, %v749_v9  ;;  %553 = vmatmul.msk.f32.vlgmr.msra.gmra.mxu3 %vm369_vm2, %v749_v9 }
 0x110   : > { %v315_v12 = vpop.f32.mrf.mxu1 }
 0x116   : > { %v360_v15 = vpop.f32.mrf.mxu2 }
 0x118   : > { %v295_v13 = vpop.f32.mrf.mxu0 }
 0x119   : > { %v316_v14 = vadd.f32 %v315_v12, %v295_v13 }
 0x11b   : > { %v363_v16 = vadd.f32 %v360_v15, %v316_v14 }
 0x11e   : > { %v406_v17 = vpop.f32.mrf.mxu3 }
 0x11f   : > { %v409_v18 = vadd.f32 %v406_v17, %v363_v16 }
 0x121   : > { %v410_v20 = vmul.f32 5.656854, %v409_v18 }
 0x123   : > { %v412_v21 = vadd.f32 %v411_v19, %v410_v20 }
 0x125   : > { %413 = vst [vmem:[%s215_s29] sm:$0xff] %v412_v21 }
 0x126   : > { %688 = shalt.err (!%p685_p9)
}
 0x127   : > { %563 = dma.vmem_to_hbm [thread:$0]  (%p810_p4), %s429_s30, 128, %s431_s4, %s415_s15  }
 0x128 PF: > { %p575_p10 = scmp.ge.s32.totalorder %s743_s17, 2  ;;  %s442_s11 = sand.u32 1, %s723_s12  }
 0x129   : > { %s443_s19 = scalar_lea.sflag [#allocation4], %s442_s11 }
 0x12a   : > { %p570_p11 = pnand %p575_p10, %p817_p8 }
 0x12c   : > { %p571_p12 = pneg %p570_p11 }
 0x12e   : > { %718 = dma.done.wait (%p571_p12), %s443_s19, 128  }
 0x12f   : > { %720 = vsyncadd (%p571_p12), %s443_s19, 4294967168  ;;  %s17_s17 = sadd.s32 1, %s743_s17   ;;  %s879_s12 = smov %s727_s13 }
 0x130   : > { %p14_p13 = scmp.ge.s32.totalorder %s17_s17, 4   ;;  %s880_s13 = smov %s731_s14 }
 0x131   : > { %s881_s14 = smov %s823_s25  ;;  %s882_s15 = smov %s739_s16 }
 0x132   : > { %s883_s16 = smov %s885_s20  ;;  %16 = sbr.rel (!%p14_p13) target bundleno = 5 (0x5), region = 81 }
 0x137   :  { %449 = vsyncpa [#allocation3], 1 }
 0x138   :  { %451 = vsyncpa [#allocation3 + $0x1], 1 }
 0x139   :  { %452 = vsyncpa [#allocation4], 1 }
 0x13a   :  { %454 = vsyncpa [#allocation4 + $0x1], 1 }

</bundles_post_ra>
